<compile_context>
chip_gen: v7x
topology: tpu7x:2x2x1
jax: 0.10.0
libtpu: 0.0.40
codegen_flags: <defaults>
</compile_context>

<pallas_src>
import jax
import jax.numpy as jnp
from jax.experimental import pallas as pl
from jax.experimental.pallas import tpu as pltpu


def _residual_kernel(x_ref, w_ref, b_ref, o_ref):
    # x_ref / o_ref: (C, TILE)  -- spatial axis lane-dense, C pads sublanes only
    # w_ref:         (C, C)     -- 1x1-conv weight (out_c, in_c), resident
    # b_ref:         (C, 1)     -- bias, resident
    x = x_ref[...].astype(jnp.float32)
    w = w_ref[...].astype(jnp.float32)
    b = b_ref[...].astype(jnp.float32)
    c = x.shape[0]

    if c <= 8:
        # Degenerate CxC contraction: skip the MXU.  Unrolled broadcast FMAs
        # on the VPU: fx[o, t] = sum_i w[o, i] * x[i, t] + b[o].
        fx = w[:, 0:1] * x[0:1, :]
        for i in range(1, c):
            fx = fx + w[:, i:i + 1] * x[i:i + 1, :]
        fx = fx + b
    else:
        # Realistic channel widths: MXU matmul.  (C, T) layout means fn(x) is
        # W @ x -- no per-step transpose of w.
        fx = jnp.dot(w, x, preferred_element_type=jnp.float32) + b

    # Residual: fn(x) + x
    o_ref[...] = (fx + x).astype(o_ref.dtype)


def _pick_spatial_tile(hw: int) -> int:
    """Largest lane-dense tile (multiple of 128, <= 2048) dividing hw."""
    if hw % 128 != 0:
        return hw  # full spatial extent (block dim == array dim is allowed)
    tile = min(hw, 2048)
    while hw % tile != 0:
        tile -= 128
    return tile


def residual_forward(x_nchw, w, b):
    """out = fn(x) + x, with fn = 1x1 conv (weight w, bias b). x is NCHW."""
    B, C, H, W = x_nchw.shape
    HW = H * W

    # Collapse trailing dims only (no transpose, no extra HBM pass).
    x3 = x_nchw.reshape(B, C, HW)
    b2 = b.reshape(C, 1)

    tile = _pick_spatial_tile(HW)
    grid = (B, HW // tile)

    out3 = pl.pallas_call(
        _residual_kernel,
        out_shape=jax.ShapeDtypeStruct((B, C, HW), x_nchw.dtype),
        grid=grid,
        in_specs=[
            # x: one batch element, all channels, a lane-dense spatial tile.
            pl.BlockSpec((None, C, tile), lambda bi, ti: (bi, 0, ti)),
            # w, b: tiny resident parameters, constant index_map -> DMA'd once.
            pl.BlockSpec((C, C), lambda bi, ti: (0, 0)),
            pl.BlockSpec((C, 1), lambda bi, ti: (0, 0)),
        ],
        out_specs=pl.BlockSpec((None, C, tile), lambda bi, ti: (bi, 0, ti)),
        compiler_params=pltpu.CompilerParams(
            dimension_semantics=("parallel", "parallel"),
        ),
    )(x3, w, b2)

    return out3.reshape(B, C, H, W)


if __name__ == "__main__":
    key = jax.random.PRNGKey(0)
    kx, kw, kb = jax.random.split(key, 3)

    B, C, H, W = 2, 4, 16, 16
    x = jax.random.normal(kx, (B, C, H, W), dtype=jnp.float32)
    # Deterministic parameters for fn (1x1 conv: out_c=C, in_c=C)
    w = jax.random.normal(kw, (C, C), dtype=jnp.float32) * 0.1
    b = jax.random.normal(kb, (C,), dtype=jnp.float32) * 0.1

    out = jax.block_until_ready(residual_forward(x, w, b))

    # Reference in plain JAX: fn(x) + x
    fx_ref = jnp.einsum("oc,bchw->bohw", w, x) + b.reshape(1, C, 1, 1)
    ref = fx_ref + x
    assert out.shape == (B, C, H, W)
    assert jnp.allclose(out, ref, atol=1e-5, rtol=1e-5)

    print("KERNEL_OK")
</pallas_src>

<mosaic_0001>
module attributes {stable_mosaic.version = 11 : i64} {
  func.func @_residual_kernel(%arg0: i32, %arg1: i32, %arg2: memref<1x4x256xf32, #tpu.memory_space<vmem>>, %arg3: memref<4x4xf32, #tpu.memory_space<vmem>>, %arg4: memref<4x1xf32, #tpu.memory_space<vmem>>, %arg5: memref<1x4x256xf32, #tpu.memory_space<vmem>>) attributes {dimension_semantics = [#tpu.dimension_semantics<parallel>, #tpu.dimension_semantics<parallel>], iteration_bounds = array<i64: 2, 1>, scalar_prefetch = 0 : i64, scratch_operands = 0 : i64, tpu.core_type = #tpu.core_type<tc>, window_params = [{transform_indices = @transform_0, window_bounds = array<i64: 1, 4, 256>}, {pipeline_mode = #tpu.pipeline_mode<synchronous>, transform_indices = @transform_1, window_bounds = array<i64: 4, 4>}, {pipeline_mode = #tpu.pipeline_mode<synchronous>, transform_indices = @transform_2, window_bounds = array<i64: 4, 1>}, {transform_indices = @transform_3, window_bounds = array<i64: 1, 4, 256>}]} {
    %c0 = arith.constant 0 : index
    %c0_0 = arith.constant 0 : index
    %c0_1 = arith.constant 0 : index
    %0 = vector.load %arg2[%c0, %c0_0, %c0_1] : memref<1x4x256xf32, #tpu.memory_space<vmem>>, vector<1x4x256xf32>
    %1 = vector.shape_cast %0 : vector<1x4x256xf32> to vector<4x256xf32>
    %c0_2 = arith.constant 0 : index
    %c0_3 = arith.constant 0 : index
    %2 = vector.load %arg3[%c0_2, %c0_3] : memref<4x4xf32, #tpu.memory_space<vmem>>, vector<4x4xf32>
    %c0_4 = arith.constant 0 : index
    %c0_5 = arith.constant 0 : index
    %3 = vector.load %arg4[%c0_4, %c0_5] : memref<4x1xf32, #tpu.memory_space<vmem>>, vector<4x1xf32>
    %4 = vector.extract_strided_slice %2 {offsets = [0, 0], sizes = [4, 1], strides = [1, 1]} : vector<4x4xf32> to vector<4x1xf32>
    %5 = vector.extract_strided_slice %1 {offsets = [0, 0], sizes = [1, 256], strides = [1, 1]} : vector<4x256xf32> to vector<1x256xf32>
    %6 = vector.broadcast %4 : vector<4x1xf32> to vector<4x256xf32>
    %7 = vector.broadcast %5 : vector<1x256xf32> to vector<4x256xf32>
    %8 = arith.mulf %6, %7 : vector<4x256xf32>
    %9 = vector.extract_strided_slice %2 {offsets = [0, 1], sizes = [4, 1], strides = [1, 1]} : vector<4x4xf32> to vector<4x1xf32>
    %10 = vector.extract_strided_slice %1 {offsets = [1, 0], sizes = [1, 256], strides = [1, 1]} : vector<4x256xf32> to vector<1x256xf32>
    %11 = vector.broadcast %9 : vector<4x1xf32> to vector<4x256xf32>
    %12 = vector.broadcast %10 : vector<1x256xf32> to vector<4x256xf32>
    %13 = arith.mulf %11, %12 : vector<4x256xf32>
    %14 = arith.addf %8, %13 : vector<4x256xf32>
    %15 = vector.extract_strided_slice %2 {offsets = [0, 2], sizes = [4, 1], strides = [1, 1]} : vector<4x4xf32> to vector<4x1xf32>
    %16 = vector.extract_strided_slice %1 {offsets = [2, 0], sizes = [1, 256], strides = [1, 1]} : vector<4x256xf32> to vector<1x256xf32>
    %17 = vector.broadcast %15 : vector<4x1xf32> to vector<4x256xf32>
    %18 = vector.broadcast %16 : vector<1x256xf32> to vector<4x256xf32>
    %19 = arith.mulf %17, %18 : vector<4x256xf32>
    %20 = arith.addf %14, %19 : vector<4x256xf32>
    %21 = vector.extract_strided_slice %2 {offsets = [0, 3], sizes = [4, 1], strides = [1, 1]} : vector<4x4xf32> to vector<4x1xf32>
    %22 = vector.extract_strided_slice %1 {offsets = [3, 0], sizes = [1, 256], strides = [1, 1]} : vector<4x256xf32> to vector<1x256xf32>
    %23 = vector.broadcast %21 : vector<4x1xf32> to vector<4x256xf32>
    %24 = vector.broadcast %22 : vector<1x256xf32> to vector<4x256xf32>
    %25 = arith.mulf %23, %24 : vector<4x256xf32>
    %26 = arith.addf %20, %25 : vector<4x256xf32>
    %27 = vector.broadcast %3 : vector<4x1xf32> to vector<4x256xf32>
    %28 = arith.addf %26, %27 : vector<4x256xf32>
    %29 = arith.addf %28, %1 : vector<4x256xf32>
    %c0_6 = arith.constant 0 : index
    %c0_7 = arith.constant 0 : index
    %c0_8 = arith.constant 0 : index
    %30 = vector.load %arg5[%c0_6, %c0_7, %c0_8] : memref<1x4x256xf32, #tpu.memory_space<vmem>>, vector<1x4x256xf32>
    %31 = vector.shape_cast %30 : vector<1x4x256xf32> to vector<4x256xf32>
    %32 = vector.shape_cast %29 : vector<4x256xf32> to vector<1x4x256xf32>
    tpu.vector_store %arg5[%c0_6, %c0_7, %c0_8], %32 {strides = array<i32>} : memref<1x4x256xf32, #tpu.memory_space<vmem>>, vector<1x4x256xf32>,
    return
  }
  func.func @transform_0(%arg0: i32, %arg1: i32) -> (i32, i32, i32) {
    %c0_i32 = arith.constant 0 : i32
    %c0_i32_0 = arith.constant 0 : i32
    return %arg0, %c0_i32, %arg1 : i32, i32, i32
  }
  func.func @transform_1(%arg0: i32, %arg1: i32) -> (i32, i32) {
    %c0_i32 = arith.constant 0 : i32
    %c0_i32_0 = arith.constant 0 : i32
    %c0_i32_1 = arith.constant 0 : i32
    return %c0_i32, %c0_i32_0 : i32, i32
  }
  func.func @transform_2(%arg0: i32, %arg1: i32) -> (i32, i32) {
    %c0_i32 = arith.constant 0 : i32
    %c0_i32_0 = arith.constant 0 : i32
    %c0_i32_1 = arith.constant 0 : i32
    return %c0_i32, %c0_i32_0 : i32, i32
  }
  func.func @transform_3(%arg0: i32, %arg1: i32) -> (i32, i32, i32) {
    %c0_i32 = arith.constant 0 : i32
    %c0_i32_0 = arith.constant 0 : i32
    return %arg0, %c0_i32, %arg1 : i32, i32, i32
  }
}

</mosaic_0001>

<bundles_post_ra>
// kernel: tpu_custom_call.1
= control target key start
LH: loop header
LB: loop body
LE: loop exit
PB: predicated region body
PF: predicated region fallthrough
CT: control target
= control target key end

     0   :  { %8 = vsyncpa [#allocation3], 0  ;;  %s843_s0 = inlined_call_operand.hbm [shape: f32[2,4,256], index: 0, kind: input, shape index: {}]   ;;  %s844_s1 = inlined_call_operand.vmem [shape: f32[4,4], index: 1, kind: input, shape index: {}]   ;;  %s845_s2 = inlined_call_operand.vmem [shape: f32[4,1], index: 2, kind: input, shape index: {}]   ;;  %s846_s3 = inlined_call_operand.hbm [shape: f32[2,4,256], index: 3, kind: output, shape index: {}]  }
   0x1   :  { %10 = vsyncpa [#allocation3 + $0x1], 0 }
   0x2   :  { %11 = vsyncpa [#allocation4], 0 }
   0x3   :  { %13 = vsyncpa [#allocation4 + $0x1], 0  ;;  %s661_s12 = smov 0   ;;  %s663_s13 = smov 0  }
   0x4   :  { %s665_s14 = smov 0   ;;  %s667_s15 = smov 0  }
   0x5   :  { %s669_s16 = smov 0   ;;  %s671_s17 = smov 0  }
   0x6 LB: > { %s431_s18 = sadd.s32 4294967295, %s633_s17   ;;  %s432_s19 = sadd.s32 4294967294, %s633_s17   ;;  %s633_s17 = sphi %s671_s17, %s19_s17   ;;  %s629_s16 = sphi %s669_s16, %s862_s16   ;;  %s625_s15 = sphi %s667_s15, %s861_s15   ;;  %s621_s14 = sphi %s665_s14, %s860_s14   ;;  %s617_s13 = sphi %s663_s13, %s859_s13   ;;  %s613_s12 = sphi %s661_s12, %s858_s12  }
   0x7   : > { %s31_s20 = sadd.s32 1, %s629_s16  ;;  %s40_s21 = sadd.s32 1, %s621_s14 }
   0x8   : > { %p33_p0 = scmp.ge.s32.totalorder %s31_s20, 2  ;;  %p47_p1 = scmp.ne.s32.totalorder %s621_s14, %s617_s13 }
   0x9   : > { %p48_p2 = scmp.eq.s32.totalorder %s633_s17, 0  ;;  %p53_p3 = scmp.ne.s32.totalorder %s617_s13, %s613_s12 }
   0xa   : > { %s864_s20 = smov (%p33_p0, %s31_s20), 0  ;;  %p54_p5 = scmp.eq.s32.totalorder %s431_s18, 0 }
   0xb   : > { %p702_p4 = por %p48_p2, %p47_p1  ;;  %s35_s23 = ssub.s32 %s629_s16, %s864_s20 }
   0xc   : > { %p121_p6 = scmp.eq.s32.totalorder %s431_s18, 1  ;;  %p38_p7 = scmp.eq.s32.totalorder %s35_s23, 0 }
   0xd   : > { %p708_p8 = por %p54_p5, %p53_p3  ;;  %p127_p10 = scmp.eq.s32.totalorder %s432_s19, 1 }
   0xe   : > { %p712_p9 = por %p121_p6, %p47_p1  ;;  %p460_p13 = scmp.lt.s32.totalorder %s633_s17, 2 }
   0xf   : > { %s717_s26 = scalar_select %p38_p7, %s621_s14, %s40_s21  }
  0x10   : > { %s850_s25 = scalar_select %p712_p9, 1, 0 }
  0x11   : > { %p719_p11 = por %p127_p10, %p53_p3  ;;  %s153_s28 = sand.u32 1, %s621_s14  }
  0x12   : > { %s435_s29 = sshll.u32 %s153_s28, 3  ;;  %s446_s30 = sshll.u32 %s629_s16, 7 }
  0x13   : > { %s851_s27 = scalar_select %p719_p11, 1, 0 }
  0x14   : > { %s730_s6 = scalar_lea.hbm %s843_s0, %s446_s30  ;;  %s157_s7 = scalar_lea.vmem [#allocation2], %s435_s29 }
  0x15   : > { %s167_s8 = sshll.u32 %s157_s7, 4  ;;  %p736_p0 = pnand %p460_p13, %p702_p4  ;;  %s732_s8 = int_to_ptr.vmem [resolvable:$true] %s167_s8 }
  0x16   : > { %s154_s10 = scalar_lea.sflag [#allocation3], %s153_s28  ;;  %s521_s11 = scalar_lea.hbm %s730_s6, 128 }
  0x17   : > { %p522_p3 = scmp.ne.s32.totalorder %s730_s6, %s521_s11  ;;  %p523_p5 = pneg %p736_p0 }
  0x18   : > { %s526_s21 = scalar_lea.hbm %s843_s0, 256  ;;  %p527_p4 = scmp.lt.u32.totalorder %s730_s6, %s843_s0 }
  0x19   : > { %p524_p6 = pnand %p523_p5, %p522_p3  ;;  %p528_p10 = scmp.lt.u32.totalorder %s526_s21, %s521_s11 }
  0x1a   : > { %p530_p12 = scmp.lt.u32.totalorder %s521_s11, %s730_s6 }
  0x1b   : > { %p525_p7 = pneg %p524_p6  ;;  %p529_p13 = por %p528_p10, %p527_p4 }
  0x1d   : > { %p531_p1 = por %p530_p12, %p529_p13 }
  0x1f   : > { %p532_p2 = pnand %p531_p1, %p525_p7 }
  0x21   : > { %535 = shalt.err (!%p532_p2)
}
  0x22   : > { %s536_s28 = scalar_lea.vmem %s732_s8, 128  ;;  %s635_s29 = smov [#allocation2]  }
  0x23   : > { %p537_p3 = scmp.ne.s32.totalorder %s732_s8, %s536_s28  ;;  %s541_s30 = sshll.u32 %s635_s29, 4  ;;  %s542_s30 = int_to_ptr.vmem [resolvable:$false] %s541_s30 }
  0x24   : > { %s543_s4 = scalar_lea.vmem %s542_s30, 256  ;;  %p544_p9 = scmp.lt.s32.totalorder %s732_s8, %s542_s30 }
  0x25   : > { %p539_p6 = pnand %p537_p3, %p523_p5  ;;  %p545_p4 = scmp.lt.s32.totalorder %s543_s4, %s536_s28 }
  0x27   : > { %p540_p11 = pneg %p539_p6  ;;  %p546_p10 = por %p545_p4, %p544_p9 }
  0x29   : > { %p547_p12 = pnand %p546_p10, %p540_p11 }
  0x2b   : > { %550 = shalt.err (!%p547_p12)
}
  0x2c   : > { %455 = dma.hbm_to_vmem [thread:$0]  (!%p736_p0), %s730_s6, 128, %s732_s8, %s154_s10  }
  0x2d   : > { %p853_p1 = scmp.lt.s32.totalorder %s633_s17, 3  ;;  %p854_p2 = scmp.ge.s32.totalorder %s633_s17, 1 }
  0x2f   : > { %p173_p5 = pnand %p854_p2, %p853_p1 }
  0x30   : > { %s772_s5 = sand.u32 (!%p173_p5), 1, %s617_s13  }
  0x31   : > { %176 = sbr.rel (%p173_p5) target bundleno = 220 (0xdc), region = 32  ;;  %s439_s7 = sshll.u32 (!%p173_p5), %s772_s5, 3 }
  0x32   : > { %s179_s11 = scalar_lea.sflag (!%p173_p5), [#allocation3], %s772_s5  ;;  %s182_s9 = scalar_lea.vmem (!%p173_p5), [#allocation2], %s439_s7 }
  0x38   : > { %604 = dma.done.wait (%p708_p8), %s179_s11, 128  }
  0x39   : > { %606 = vsyncadd (%p708_p8), %s179_s11, 4294967168  ;;  %v636_v0 = vmov 0   ;;  %v637_v1 = vmov 2   ;;  %v208_v2 = vld [vmem:[%s844_s1] sm:$0xf]  ;;  %v638_v3 = vmov 1   ;;  %v216_v6 = vlaneseq }
  0x3a   : > { %514 = vset.pattern.permute.xlu0 %v636_v0  ;;  %516 = vset.pattern.permute.xlu1 %v637_v1  ;;  %v639_v4 = vmov 3   ;;  %v209_v5 = vld [vmem:[%s845_s2] sm:$0xf]  ;;  %s447_s24 = sshll.u32 %s625_s15, 7  ;;  %s204_s19 = scalar_lea.vmem [#allocation5], %s439_s7 }
  0x3b   : > { %212 = vperm.xlu0 %514, %v208_v2   ;;  %263 = vperm.xlu1 %516, %v208_v2   ;;  %v217_v7 = vshrl.u32 %v216_v6, 7  ;;  %v207_v12 = vld [vmem:[%s182_s9] sm:$0xff]  ;;  %s347_s21 = sshll.u32 %s204_s19, 4  ;;  %s794_s28 = scalar_lea.hbm %s846_s3, %s447_s24  ;;  %s796_s21 = int_to_ptr.vmem [resolvable:$true] %s347_s21 }
  0x3c   : > { %v321_v52 = vcombine.high %v207_v12, %v207_v12  ;;  %s331_s29 = scalar_lea.sflag [#allocation4], %s772_s5  ;;  %s551_s30 = scalar_lea.vmem %s796_s21, 128 }
  0x3d   : > { %v218_v8 = vsub.s32 0, %v217_v7  ;;  %v222_v9 = vsub.s32 4, %v217_v7  ;;  %v242_v10 = vsub.s32 1, %v217_v7  ;;  %v246_v11 = vsub.s32 5, %v217_v7  ;;  %p552_p8 = scmp.ne.s32.totalorder %s796_s21, %s551_s30  ;;  %p855_p9 = scmp.ne.s32.totalorder %s850_s25, 0 }
  0x3e   : > { %v268_v13 = vsub.s32 2, %v217_v7  ;;  %v272_v14 = vsub.s32 6, %v217_v7  ;;  %v294_v15 = vsub.s32 3, %v217_v7  ;;  %v298_v16 = vsub.s32 7, %v217_v7  ;;  %s640_s15 = smov [#allocation5]  }
  0x3f   : > { %515 = vset.pattern.permute.xlu0 %v638_v3  ;;  %517 = vset.pattern.permute.xlu1 %v639_v4  ;;  %v219_v17 = vrot.slane %v207_v12, %v218_v8  ;;  %v223_v18 = vrot.slane %v207_v12, %v222_v9  ;;  %v243_v19 = vrot.slane %v207_v12, %v242_v10  ;;  %p553_p11 = pnand %p552_p8, %p855_p9  ;;  %s555_s4 = sshll.u32 %s640_s15, 4  ;;  %s556_s4 = int_to_ptr.vmem [resolvable:$false] %s555_s4 }
  0x40   : > { %237 = vperm.xlu0 %515, %v208_v2   ;;  %289 = vperm.xlu1 %517, %v208_v2   ;;  %v247_v20 = vrot.slane %v207_v12, %v246_v11  ;;  %v269_v21 = vrot.slane %v207_v12, %v268_v13  ;;  %v273_v22 = vrot.slane %v207_v12, %v272_v14  ;;  %s557_s7 = scalar_lea.vmem %s556_s4, 256  ;;  %p558_p7 = scmp.lt.s32.totalorder %s796_s21, %s556_s4 }
  0x41   : > { %v295_v25 = vrot.slane %v207_v12, %v294_v15  ;;  %v299_v26 = vrot.slane %v207_v12, %v298_v16  ;;  %v229_v27 = vrot.slane %v219_v17, %v218_v8  ;;  %v233_v28 = vrot.slane %v223_v18, %v218_v8  ;;  %p554_p0 = pneg %p553_p11  ;;  %p559_p13 = scmp.lt.s32.totalorder %s557_s7, %s551_s30 }
  0x42   : > { %v253_v29 = vrot.slane %v243_v19, %v242_v10  ;;  %v257_v30 = vrot.slane %v247_v20, %v242_v10  ;;  %v279_v31 = vrot.slane %v269_v21, %v268_v13  ;;  %v283_v32 = vrot.slane %v273_v22, %v268_v13 }
  0x43   : > { %v305_v33 = vrot.slane %v295_v25, %v294_v15  ;;  %v309_v34 = vrot.slane %v299_v26, %v294_v15  ;;  %p560_p3 = por %p559_p13, %p558_p7 }
  0x44   : > { %518 = vset.pattern.permute.xlu1 %v636_v0  ;;  %519 = vset.pattern.permute.xlu0 %v636_v0 }
  0x45   : > { %316 = vperm.xlu1 %518, %v209_v5   ;;  %p561_p6 = pnand %p560_p3, %p554_p0 }
  0xba   : > { %v213_v23 = vpop.permute.xlu0 %212  ;;  %v264_v24 = vpop.permute.xlu1 %263 }
  0xbb   : > { %v234_v37 = vmul.f32 %v229_v27, %v213_v23  ;;  %v235_v38 = vmul.f32 %v233_v28, %v213_v23  ;;  %v284_v41 = vmul.f32 %v279_v31, %v264_v24  ;;  %v285_v42 = vmul.f32 %v283_v32, %v264_v24 }
  0xbf   : > { %v238_v35 = vpop.permute.xlu0 %237  ;;  %v290_v36 = vpop.permute.xlu1 %289 }
  0xc0   : > { %v258_v39 = vmul.f32 %v253_v29, %v238_v35  ;;  %v259_v40 = vmul.f32 %v257_v30, %v238_v35  ;;  %v310_v45 = vmul.f32 %v305_v33, %v290_v36  ;;  %v311_v46 = vmul.f32 %v309_v34, %v290_v36 }
  0xc2   : > { %v260_v43 = vadd.f32 %v258_v39, %v234_v37  ;;  %v261_v44 = vadd.f32 %v259_v40, %v235_v38 }
  0xc4   : > { %v286_v47 = vadd.f32 %v284_v41, %v260_v43  ;;  %v287_v48 = vadd.f32 %v285_v42, %v261_v44  ;;  %v317_v49 = vpop.permute.xlu1 %316 }
  0xc6   : > { %v312_v50 = vadd.f32 %v310_v45, %v286_v47  ;;  %v313_v51 = vadd.f32 %v311_v46, %v287_v48 }
  0xc8   : > { %v319_v53 = vadd.f32 %v317_v49, %v312_v50  ;;  %v320_v54 = vadd.f32 %v317_v49, %v313_v51 }
  0xca   : > { %v323_v55 = vadd.f32 %v319_v53, %v207_v12  ;;  %v324_v56 = vadd.f32 %v321_v52, %v320_v54 }
  0xcc   : > { %v327_v57 = vcombine.low %v323_v55, %v324_v56 }
  0xce   : > { %329 = vst [vmem:[%s204_s19] sm:$0xff] %v327_v57 }
  0xcf   : > { %564 = shalt.err (!%p561_p6)
}
  0xd0   : > { %s565_s5 = scalar_lea.hbm %s794_s28, 128  ;;  %s569_s6 = scalar_lea.hbm %s846_s3, 256 }
  0xd1   : > { %p566_p4 = scmp.ne.s32.totalorder %s794_s28, %s565_s5  ;;  %p570_p1 = scmp.lt.u32.totalorder %s794_s28, %s846_s3 }
  0xd2   : > { %p571_p2 = scmp.lt.u32.totalorder %s569_s6, %s565_s5  ;;  %p573_p8 = scmp.lt.u32.totalorder %s565_s5, %s794_s28 }
  0xd3   : > { %p567_p10 = pnand %p566_p4, %p855_p9 }
  0xd4   : > { %p572_p5 = por %p571_p2, %p570_p1 }
  0xd5   : > { %p568_p12 = pneg %p567_p10 }
  0xd6   : > { %p574_p11 = por %p573_p8, %p572_p5 }
  0xd8   : > { %p575_p0 = pnand %p574_p11, %p568_p12 }
  0xda   : > { %578 = shalt.err (!%p575_p0)
}
  0xdb   : > { %450 = dma.vmem_to_hbm [thread:$0]  (%p855_p9), %s796_s21, 128, %s794_s28, %s331_s29  }
  0xdc PF: > { %s359_s18 = sand.u32 1, %s613_s12   ;;  %p856_p7 = scmp.ne.s32.totalorder %s851_s27, 0 }
  0xdd   : > { %p857_p13 = scmp.ge.s32.totalorder %s633_s17, 2  ;;  %s360_s24 = scalar_lea.sflag [#allocation4], %s359_s18 }
  0xdf   : > { %p457_p3 = pnand %p857_p13, %p856_p7 }
  0xe1   : > { %608 = dma.done.wait (!%p457_p3), %s360_s24, 128  }
  0xe2   : > { %610 = vsyncadd (!%p457_p3), %s360_s24, 4294967168  ;;  %s19_s17 = sadd.s32 1, %s633_s17   ;;  %s858_s12 = smov %s617_s13 }
  0xe3   : > { %p16_p6 = scmp.ge.s32.totalorder %s19_s17, 4   ;;  %s859_s13 = smov %s621_s14 }
  0xe4   : > { %s860_s14 = smov %s717_s26  ;;  %s861_s15 = smov %s629_s16 }
  0xe5   : > { %s862_s16 = smov %s864_s20  ;;  %18 = sbr.rel (!%p16_p6) target bundleno = 6 (0x6), region = 77 }
  0xec   :  { %365 = vsyncpa [#allocation3], 1 }
  0xed   :  { %367 = vsyncpa [#allocation3 + $0x1], 1 }
  0xee   :  { %368 = vsyncpa [#allocation4], 1 }
  0xef   :  { %370 = vsyncpa [#allocation4 + $0x1], 1 }

</bundles_post_ra>
